<compile_context>
chip_gen: v6e
topology: v6e:2x2x1
jax: 0.10.0
libtpu: 0.0.40
codegen_flags: <defaults>
</compile_context>

<pallas_src>
import jax
import jax.numpy as jnp
from jax.experimental import pallas as pl
from jax.experimental.pallas import tpu as pltpu

_LANES = 128
_SUBLANES = 8


def _step_quant_kernel(params_ref, z_ref, o_ref):
    # params_ref: (2,) float32 in SMEM -> [step, shift]
    step = params_ref[0]
    shift = params_ref[1]
    # Compute in f32; cast back to the output dtype on the store.
    z = z_ref[...].astype(jnp.float32)
    q = jnp.floor((z - shift) / step)
    o_ref[...] = (q * step + shift).astype(o_ref.dtype)


def step_quantizer(z, step=1.0, shift=0.0):
    """Elementwise step quantizer. Works for any input shape / float dtype."""
    orig_shape = z.shape
    orig_dtype = z.dtype
    n = z.size
    itemsize = jnp.dtype(orig_dtype).itemsize

    # ---- present data as a lane-dense (rows, 128) slab ------------------
    flat = jnp.reshape(z, (-1,))
    rows = pl.cdiv(n, _LANES)
    n_pad = rows * _LANES
    padded = n_pad != n
    if padded:
        # TODO(synk): the ragged (<128-element) tail could be handled with a
        # masked pltpu.store on the last grid step to avoid this extra pass.
        flat = jnp.pad(flat, (0, n_pad - n))
    x2d = jnp.reshape(flat, (rows, _LANES))

    # ---- block size: ~2 MiB per block, respecting packed-sublane tiling --
    # sublane multiple: 8 for 32-bit, 16 for 16-bit, 32 for 8-bit dtypes.
    sub_mult = _SUBLANES * max(1, 4 // itemsize)
    target_rows = max(sub_mult, (2 * 1024 * 1024) // (_LANES * itemsize))
    if rows <= target_rows:
        # Small arrays: one (or few) blocks; full-array block is legal when
        # rows < sub_mult, otherwise round down to the sublane multiple and
        # let Pallas mask the partial last block.
        br = rows if rows < sub_mult else (rows // sub_mult) * sub_mult
    else:
        br = target_rows  # already a multiple of sub_mult
    grid = (pl.cdiv(rows, br),)

    params = jnp.array([step, shift], dtype=jnp.float32)

    cost = pl.CostEstimate(
        flops=5 * n_pad,                      # sub, div, floor, mul, add
        transcendentals=0,
        bytes_accessed=2 * n_pad * itemsize,  # one read + one write
    )

    out2d = pl.pallas_call(
        _step_quant_kernel,
        out_shape=jax.ShapeDtypeStruct((rows, _LANES), orig_dtype),
        grid_spec=pltpu.PrefetchScalarGridSpec(
            num_scalar_prefetch=0,
            grid=grid,
            in_specs=[
                pl.BlockSpec(memory_space=pltpu.MemorySpace.SMEM),  # [step, shift]
                pl.BlockSpec((br, _LANES), lambda i: (i, 0)),
            ],
            out_specs=pl.BlockSpec((br, _LANES), lambda i: (i, 0)),
        ),
        compiler_params=pltpu.CompilerParams(
            dimension_semantics=("parallel",)),
        cost_estimate=cost,
    )(params, x2d)

    out = jnp.reshape(out2d, (-1,))
    if padded:
        out = out[:n]
    return jnp.reshape(out, orig_shape)


def _reference(z, step=1.0, shift=0.0):
    zf = z.astype(jnp.float32)
    return (jnp.floor((zf - shift) / step) * step + shift).astype(z.dtype)


if __name__ == "__main__":
    key = jax.random.PRNGKey(0)
    # NCHW-style input, small shape (size is a multiple of 128 -> fast path).
    x = jax.random.normal(key, (2, 4, 16, 16), dtype=jnp.float32) * 3.0
    step, shift = 0.5, 0.25

    y = jax.block_until_ready(step_quantizer(x, step=step, shift=shift))
    y_ref = _reference(x, step=step, shift=shift)
    assert y.shape == x.shape and y.dtype == x.dtype
    assert jnp.allclose(y, y_ref, atol=1e-6), "f32 mismatch vs reference"

    # Unaligned-size fallback path (n not a multiple of 128).
    x2 = jax.random.normal(jax.random.PRNGKey(1), (3, 5, 7), dtype=jnp.float32)
    y2 = jax.block_until_ready(step_quantizer(x2, step=0.25, shift=-0.5))
    assert jnp.allclose(y2, _reference(x2, step=0.25, shift=-0.5), atol=1e-6), \
        "unaligned mismatch vs reference"

    # bf16 input: compute in f32 inside the kernel, cast back on store.
    xb = x.astype(jnp.bfloat16)
    yb = jax.block_until_ready(step_quantizer(xb, step=step, shift=shift))
    yb_ref = _reference(xb, step=step, shift=shift)
    assert yb.dtype == jnp.bfloat16
    assert jnp.allclose(yb.astype(jnp.float32), yb_ref.astype(jnp.float32),
                        atol=1e-2), "bf16 mismatch vs reference"

    print("KERNEL_OK")
</pallas_src>

<mosaic_0001>
module attributes {stable_mosaic.version = 11 : i64} {
  func.func @_step_quant_kernel(%arg0: i32, %arg1: memref<2xf32, #tpu.memory_space<smem>>, %arg2: memref<16x128xf32, #tpu.memory_space<vmem>>, %arg3: memref<16x128xf32, #tpu.memory_space<vmem>>) attributes {dimension_semantics = [#tpu.dimension_semantics<parallel>], iteration_bounds = array<i64: 1>, scalar_prefetch = 0 : i64, scratch_operands = 0 : i64, tpu.core_type = #tpu.core_type<tc>, window_params = [{transform_indices = @transform_0, window_bounds = array<i64: 2>}, {transform_indices = @transform_1, window_bounds = array<i64: 16, 128>}, {transform_indices = @transform_2, window_bounds = array<i64: 16, 128>}]} {
    %c0 = arith.constant 0 : index
    %0 = memref.load %arg1[%c0] : memref<2xf32, #tpu.memory_space<smem>>
    %c1 = arith.constant 1 : index
    %1 = memref.load %arg1[%c1] : memref<2xf32, #tpu.memory_space<smem>>
    %c0_0 = arith.constant 0 : index
    %c0_1 = arith.constant 0 : index
    %2 = vector.load %arg2[%c0_0, %c0_1] : memref<16x128xf32, #tpu.memory_space<vmem>>, vector<16x128xf32>
    %3 = vector.broadcast %1 : f32 to vector<16x128xf32>
    %4 = arith.subf %2, %3 : vector<16x128xf32>
    %5 = vector.broadcast %0 : f32 to vector<16x128xf32>
    %6 = arith.divf %4, %5 : vector<16x128xf32>
    %7 = math.floor %6 : vector<16x128xf32>
    %8 = vector.broadcast %0 : f32 to vector<16x128xf32>
    %9 = arith.mulf %7, %8 : vector<16x128xf32>
    %10 = vector.broadcast %1 : f32 to vector<16x128xf32>
    %11 = arith.addf %9, %10 : vector<16x128xf32>
    %c0_2 = arith.constant 0 : index
    %c0_3 = arith.constant 0 : index
    %12 = vector.load %arg3[%c0_2, %c0_3] : memref<16x128xf32, #tpu.memory_space<vmem>>, vector<16x128xf32>
    tpu.vector_store %arg3[%c0_2, %c0_3], %11 {strides = array<i32>} : memref<16x128xf32, #tpu.memory_space<vmem>>, vector<16x128xf32>,
    return
  }
  func.func @transform_0(%arg0: i32) -> i32 {
    %c0_i32 = arith.constant 0 : i32
    %c0_i32_0 = arith.constant 0 : i32
    return %c0_i32 : i32
  }
  func.func @transform_1(%arg0: i32) -> (i32, i32) {
    %c0_i32 = arith.constant 0 : i32
    %c0_i32_0 = arith.constant 0 : i32
    return %arg0, %c0_i32 : i32, i32
  }
  func.func @transform_2(%arg0: i32) -> (i32, i32) {
    %c0_i32 = arith.constant 0 : i32
    %c0_i32_0 = arith.constant 0 : i32
    return %arg0, %c0_i32 : i32, i32
  }
}

</mosaic_0001>

<bundles_post_ra>
// kernel: tpu_custom_call.1
= control target key start
LH: loop header
LB: loop body
LE: loop exit
PB: predicated region body
PF: predicated region fallthrough
CT: control target
= control target key end

     0   :  { %7 = vsyncpa [#allocation5], 0  ;;  %s171_s0 = inlined_call_operand.hbm [shape: f32[2], index: 0, kind: input, shape index: {}]   ;;  %s172_s1 = inlined_call_operand.hbm [shape: f32[16,128], index: 1, kind: input, shape index: {}]   ;;  %s173_s2 = inlined_call_operand.hbm [shape: f32[16,128], index: 2, kind: output, shape index: {}]  }
   0x1   :  { %8 = vsyncpa [#allocation3], 0 }
   0x2   :  { %9 = vsyncpa [#allocation4], 0  ;;  %s136_s9 = smov [#allocation2]   ;;  %s137_s12 = smov [#allocation6]  }
   0x3   :  { %17 = dma.hbm_to_smem %s171_s0, 16, %s136_s9, [#allocation5]  }
   0x4   :  { %s23_s13 = sshll.u32 %s137_s12, 4  ;;  %s24_s13 = int_to_ptr.vmem [resolvable:$true] %s23_s13 }
   0x5   :  { %s98_s14 = scalar_lea.vmem %s24_s13, 256  ;;  %p103_p1 = scmp.lt.s32.totalorder %s24_s13, %s24_s13 }
   0x6   :  { %p99_p0 = scmp.ne.s32.totalorder %s24_s13, %s98_s14  ;;  %p104_p2 = scmp.lt.s32.totalorder %s98_s14, %s98_s14 }
   0x8   :  { %p105_p3 = por %p104_p2, %p103_p1 }
   0xa   :  { %p106_p4 = pnand %p105_p3, %p99_p0 }
   0xc   :  { %109 = shalt.err (!%p106_p4)
}
   0xd   :  { %s138_s15 = smov 128   ;;  %s139_s16 = smov 8  }
   0xe   :  { %29 = dma.hbm_to_vmem [thread:$0]  %s172_s1, 256, %s24_s13, [#allocation3], %s138_s15, %s138_s15, %s139_s16  }
   0xf   :  { %130 = dma.done.wait [#allocation5], 16  }
  0x10   :  { %131 = vsyncadd [#allocation5], 4294967280 }
  0x11   :  { %132 = dma.done.wait [#allocation3], 256  }
  0x12   :  { %133 = vsyncadd [#allocation3], 4294967040 }
  0x13   :  { %36 = sfence }
  0x14   :  { %s37_s0 = sld [smem:[#allocation2]]  ;;  %v39_v1 = vld [vmem:[#allocation6] sm:$0xff]  ;;  %v40_v3 = vld [vmem:[#allocation6 + $0x8] sm:$0xff]  ;;  %s140_s1 = smov [#allocation7]  }
  0x15   :  { %s74_s19 = sld [smem:[#allocation2 + $0x1]]  ;;  %s61_s20 = sshll.u32 %s140_s1, 4  ;;  %s62_s20 = int_to_ptr.vmem [resolvable:$true] %s61_s20 }
  0x16   :  { %s110_s21 = scalar_lea.vmem %s62_s20, 256  ;;  %p115_p6 = scmp.lt.s32.totalorder %s62_s20, %s62_s20 }
  0x17   :  { %p111_p5 = scmp.ne.s32.totalorder %s62_s20, %s110_s21  ;;  %p116_p7 = scmp.lt.s32.totalorder %s110_s21, %s110_s21 }
  0x19   :  { %p117_p8 = por %p116_p7, %p115_p6 }
  0x1a   :  { %v44_v0 = vstv %s37_s0 }
  0x1b   :  { %80 = vrcp.f32 %v44_v0  ;;  %v41_v2 = vstv %s74_s19  ;;  %p118_p9 = pnand %p117_p8, %p111_p5 }
  0x1c   :  { %v42_v4 = vsub.f32 %v39_v1, %v41_v2  ;;  %v43_v5 = vsub.f32 %v40_v3, %v41_v2 }
  0x28   :  { %v81_v6 = vpop.eup %80 }
  0x29   :  { %v46_v7 = vmul.f32 %v81_v6, %v42_v4  ;;  %v47_v8 = vmul.f32 %v81_v6, %v43_v5 }
  0x2b   :  { %v48_v9 = vfloor.f32 %v46_v7  ;;  %v49_v10 = vfloor.f32 %v47_v8 }
  0x2d   :  { %v50_v11 = vmul.f32 %v48_v9, %v44_v0  ;;  %v51_v12 = vmul.f32 %v49_v10, %v44_v0 }
  0x2f   :  { %v52_v13 = vadd.f32 %v50_v11, %v41_v2  ;;  %v53_v14 = vadd.f32 %v51_v12, %v41_v2 }
  0x31   :  { %54 = vst [vmem:[#allocation7] sm:$0xff] %v52_v13  ;;  %55 = vst [vmem:[#allocation7 + $0x8] sm:$0xff] %v53_v14 }
  0x32   :  { %121 = shalt.err (!%p118_p9)
}
  0x33   :  { %67 = dma.vmem_to_hbm [thread:$0]  %s62_s20, 256, %s173_s2, [#allocation4], %s138_s15, %s138_s15, %s139_s16  }
  0x34   :  { %134 = dma.done.wait [#allocation4], 256  }
  0x35   :  { %135 = vsyncadd [#allocation4], 4294967040 }
  0x36   :  { %71 = vsyncpa [#allocation3], 1 }
  0x37   :  { %72 = vsyncpa [#allocation4], 1 }
  0x38   :  { %73 = vsyncpa [#allocation5], 1 }

</bundles_post_ra>
